<compile_context>
chip_gen: v7x
topology: tpu7x:2x2x1
jax: 0.10.0
libtpu: 0.0.40
codegen_flags: <defaults>
</compile_context>

<pallas_src>
import jax
import jax.numpy as jnp
from jax.experimental import pallas as pl
from jax.experimental.pallas import tpu as pltpu


# ---------------------------------------------------------------------------
# Primary path: aliased no-op (zero HBM traffic).
# ---------------------------------------------------------------------------
def _noop_kernel(x_hbm_ref, o_hbm_ref):
    # Output buffer is aliased to the input buffer, so identity needs no DMA
    # and no compute. Intentionally empty.
    del x_hbm_ref, o_hbm_ref


def dummy_head_forward(x):
    """Identity forward pass matching DummyHead.forward(x) -> x.

    Issues zero DMA: input and output share the same buffer via
    input_output_aliases, and the kernel body is empty.
    """
    return pl.pallas_call(
        _noop_kernel,
        out_shape=jax.ShapeDtypeStruct(x.shape, x.dtype),
        in_specs=[pl.BlockSpec(memory_space=pl.ANY)],
        out_specs=pl.BlockSpec(memory_space=pl.ANY),
        input_output_aliases={0: 0},
    )(x)


# ---------------------------------------------------------------------------
# Fallback path: lane-dense tiled copy (only if a fresh buffer is required).
# ---------------------------------------------------------------------------
def _copy_kernel(x_ref, o_ref):
    o_ref[...] = x_ref[...]


def _lane_dense_width(n_elems, last_dim):
    # Widest lane-dense (multiple-of-128) last dim that divides the flat size;
    # fall back to the original last dim otherwise.
    for lanes in (1024, 512, 256, 128):
        if n_elems % lanes == 0:
            return lanes
    return last_dim


def dummy_head_forward_copy(x, row_tile=512):
    """Identity that materialises a fresh output buffer (tiled HBM copy)."""
    orig_shape = x.shape
    lanes = _lane_dense_width(x.size, orig_shape[-1])
    x2d = x.reshape(-1, lanes)
    rows = x2d.shape[0]
    rt = min(row_tile, rows)  # 512 x 1024 f32 tile = 2 MiB per buffer

    out2d = pl.pallas_call(
        _copy_kernel,
        out_shape=jax.ShapeDtypeStruct(x2d.shape, x2d.dtype),
        grid=(pl.cdiv(rows, rt),),
        in_specs=[pl.BlockSpec((rt, lanes), lambda i: (i, 0))],
        out_specs=pl.BlockSpec((rt, lanes), lambda i: (i, 0)),
        compiler_params=pltpu.CompilerParams(
            dimension_semantics=("parallel",),  # megacore sharding on v7x
        ),
    )(x2d)
    return out2d.reshape(orig_shape)


if __name__ == "__main__":
    key = jax.random.PRNGKey(0)
    # Small NCHW input consistent with a conv-style head: batch=2, C=4, H=W=16
    x = jax.random.normal(key, (2, 4, 16, 16), dtype=jnp.float32)

    # Primary zero-copy path.
    y = jax.block_until_ready(dummy_head_forward(x))
    assert y.shape == x.shape and y.dtype == x.dtype
    assert jnp.array_equal(y, x)

    # Fallback lane-dense tiled copy path (exercised to keep it verified).
    y2 = jax.block_until_ready(dummy_head_forward_copy(x))
    assert y2.shape == x.shape and y2.dtype == x.dtype
    assert jnp.array_equal(y2, x)

    print("KERNEL_OK")
</pallas_src>

<mosaic_0001>
module attributes {stable_mosaic.version = 11 : i64} {
  func.func @_noop_kernel(%arg0: memref<2x4x16x16xf32, #tpu.memory_space<any>>, %arg1: memref<2x4x16x16xf32, #tpu.memory_space<any>>) attributes {dimension_semantics = [], scalar_prefetch = 0 : i64, scratch_operands = 0 : i64, tpu.core_type = #tpu.core_type<tc>} {
    return
  }
}

</mosaic_0001>

<bundles_post_ra>
// kernel: tpu_custom_call.1
= control target key start
LH: loop header
LB: loop body
LE: loop exit
PB: predicated region body
PF: predicated region fallthrough
CT: control target
= control target key end

     0   :  { %s16_s0 = inlined_call_operand.hbm [shape: f32[2,4,16,16], index: 0, kind: input, shape index: {}, may-alias: {0,1}]   ;;  %s17_s1 = inlined_call_operand.hbm [shape: f32[2,4,16,16], index: 1, kind: output, shape index: {}, may-alias: {0,1}]  }

</bundles_post_ra>
